<compile_context>
chip_gen: v7x
topology: tpu7x:2x2x1
jax: 0.10.0
libtpu: 0.0.40
codegen_flags: <defaults>
</compile_context>

<pallas_src>
import jax
import jax.numpy as jnp
from jax.experimental import pallas as pl
from jax.experimental.pallas import tpu as pltpu


# --------------------------- parameter packing ------------------------------ #
def _pack_slab(named_mats, dtype, row_align):
    """Stack 2-D parameter matrices into one [rows, lane_width] slab.

    Each matrix starts at a row offset that is a multiple of `row_align` so the
    in-kernel static slices are sublane aligned.  Returns (slab, offsets) with
    offsets[name] = (row_start, n_rows, n_cols).
    """
    max_c = max(m.shape[1] for _, m in named_mats)
    lane_width = max(128, ((max_c + 127) // 128) * 128)
    offsets = {}
    row = 0
    for name, m in named_mats:
        r, c = m.shape
        offsets[name] = (row, r, c)
        row += -(-r // row_align) * row_align
    slab = jnp.zeros((max(row, row_align), lane_width), dtype)
    for name, m in named_mats:
        r0, r, c = offsets[name]
        slab = slab.at[r0:r0 + r, :c].set(m.astype(dtype))
    return slab, offsets


# ------------------------------ Pallas kernel ------------------------------- #
def _make_kernel(B, TN, C, H, woff, poff):
    f32, bf16 = jnp.float32, jnp.bfloat16

    def wsl(ref, name):            # bf16 weight slab slice (static, aligned)
        r0, r, c = woff[name]
        return ref[r0:r0 + r, 0:c]

    def psl(ref, name):            # f32 bias/LN slab slice (static, aligned)
        r0, r, c = poff[name]
        return ref[r0:r0 + r, 0:c]

    def kernel(q_ref, m_ref, invc_ref, wslab_ref, pslab_ref,
               z_ref, r9_ref, pooled_acc):
        step = pl.program_id(0)

        # -------- init masked-pool accumulator --------
        @pl.when(step == 0)
        def _():
            pooled_acc[...] = jnp.zeros_like(pooled_acc)

        # -------- DeepSets phi MLP on this tile of points (bf16 MXU, f32 acc) ----
        q = q_ref[...].reshape(B * TN, 3).astype(bf16)                   # [B*TN, 3]
        h1 = jnp.maximum(
            jnp.dot(q, wsl(wslab_ref, "W1"), preferred_element_type=f32)
            + psl(pslab_ref, "b1"), 0.0)                                 # [B*TN, H]
        h2 = jnp.maximum(
            jnp.dot(h1.astype(bf16), wsl(wslab_ref, "W2"),
                    preferred_element_type=f32)
            + psl(pslab_ref, "b2"), 0.0)                                 # [B*TN, H]

        # masked partial sum over this tile's points (no block-diag mask matmul)
        pooled_acc[...] += jnp.sum(h2.reshape(B, TN, H) * m_ref[...], axis=1)

        # -------- finalize: rho linear, LayerNorm, RotationHead, Gram-Schmidt ----
        @pl.when(step == pl.num_programs(0) - 1)
        def _():
            pooled = pooled_acc[...] * invc_ref[...]                     # masked mean
            z = (jnp.dot(pooled.astype(bf16), wsl(wslab_ref, "W3"),
                         preferred_element_type=f32)
                 + psl(pslab_ref, "b3"))                                 # [B, L]
            z_ref[...] = z

            # LayerNorm over latent dim (f32 elementwise path)
            mu = jnp.mean(z, axis=1, keepdims=True)
            var = jnp.mean((z - mu) ** 2, axis=1, keepdims=True)
            zn = ((z - mu) * jax.lax.rsqrt(var + 1e-5)
                  * psl(pslab_ref, "gamma") + psl(pslab_ref, "beta"))

            # RotationHead: relu([zn | 0.3*Bflat] @ Wr1 + br1) @ Wr2 + br2
            # (0.3 folded into Wr1b at pack time; the per-candidate repeat is a
            #  broadcast-add instead of repeat/tile matmuls)
            t_z = jnp.dot(zn.astype(bf16), wsl(wslab_ref, "Wr1a"),
                          preferred_element_type=f32)                    # [B, Hr]
            t_b = (jnp.dot(wsl(wslab_ref, "Bflat"), wsl(wslab_ref, "Wr1b"),
                           preferred_element_type=f32)
                   + psl(pslab_ref, "br1"))                              # [C, Hr]
            h2d = jnp.concatenate(
                [jnp.maximum(t_z[b:b + 1, :] + t_b, 0.0) for b in range(B)],
                axis=0)                                                  # [B*C, Hr]
            out6 = (jnp.dot(h2d.astype(bf16), wsl(wslab_ref, "Wr2"),
                            preferred_element_type=f32)
                    + psl(pslab_ref, "br2"))                             # [B*C, 6]

            # 6-D -> SO(3) via Gram-Schmidt (f32); rows of R are e1, e2, e1 x e2
            eps = 1e-8
            a1, a2 = out6[:, 0:3], out6[:, 3:6]
            e1 = a1 * jax.lax.rsqrt(jnp.sum(a1 * a1, axis=1, keepdims=True) + eps)
            u2 = a2 - jnp.sum(e1 * a2, axis=1, keepdims=True) * e1
            e2 = u2 * jax.lax.rsqrt(jnp.sum(u2 * u2, axis=1, keepdims=True) + eps)
            e1x, e1y, e1z = e1[:, 0:1], e1[:, 1:2], e1[:, 2:3]
            e2x, e2y, e2z = e2[:, 0:1], e2[:, 1:2], e2[:, 2:3]
            e3 = jnp.concatenate([e1y * e2z - e1z * e2y,
                                  e1z * e2x - e1x * e2z,
                                  e1x * e2y - e1y * e2x], axis=1)
            # single lane-contiguous store instead of six narrow column stores
            r9_ref[...] = jnp.concatenate([e1, e2, e3], axis=1)

    return kernel


# ------------------------------ JAX wrapper --------------------------------- #
def init_params(key, H=64, L=32, Hr=64, C=2):
    """Deterministic PyTorch-Linear-style init (uniform +- 1/sqrt(fan_in))."""
    ks = jax.random.split(key, 8)

    def lin(k, fi, fo):
        bound = 1.0 / jnp.sqrt(fi)
        kw, kb = jax.random.split(k)
        w = jax.random.uniform(kw, (fi, fo), jnp.float32, -bound, bound)
        b = jax.random.uniform(kb, (1, fo), jnp.float32, -bound, bound)
        return w, b

    W1, b1 = lin(ks[0], 3, H)
    W2, b2 = lin(ks[1], H, H)
    W3, b3 = lin(ks[2], H, L)
    gamma = jnp.ones((1, L), jnp.float32)
    beta = jnp.zeros((1, L), jnp.float32)
    Wr1, br1 = lin(ks[3], L + 9, Hr)
    Wr2, br2 = lin(ks[4], Hr, 6)
    # UnitCell candidates: deterministic reciprocal-basis matrices [C, 3, 3]
    B_candidates = jnp.stack(
        [jnp.eye(3, dtype=jnp.float32) * (1.0 + 0.25 * i)
         + 0.05 * i * jnp.triu(jnp.ones((3, 3), jnp.float32), 1)
         for i in range(C)])
    return dict(W1=W1, b1=b1, W2=W2, b2=b2, W3=W3, b3=b3,
                gamma=gamma, beta=beta,
                Wr1a=Wr1[:L, :], Wr1b=Wr1[L:, :], br1=br1,
                Wr2=Wr2, br2=br2, B_candidates=B_candidates)


def qtor_forward(params, Q_batch, mask=None, tile_n=8, interpret=False):
    B, N, _ = Q_batch.shape
    C = params["B_candidates"].shape[0]
    H = params["W1"].shape[1]
    L = params["W3"].shape[1]

    if mask is None:
        mask = jnp.ones((B, N), jnp.float32)
    else:
        mask = mask.astype(jnp.float32)

    # pad the point axis to a multiple of the tile (padded points are masked out)
    num_tiles = (N + tile_n - 1) // tile_n
    Np = num_tiles * tile_n
    q = jnp.zeros((B, Np, 3), jnp.float32).at[:, :N, :].set(Q_batch.astype(jnp.float32))
    m = jnp.zeros((B, Np, 1), jnp.float32).at[:, :N, 0].set(mask)
    # masked-mean scale, clamped so an all-masked sample gives 0 instead of NaN
    inv_cnt = 1.0 / jnp.maximum(jnp.sum(mask, axis=1, keepdims=True), 1.0)

    bflat = params["B_candidates"].reshape(C, 9)
    # one bf16 slab for all MXU operands (0.3 from `0.3 * B_flat` folded into Wr1b)
    wslab, woff = _pack_slab(
        [("W1", params["W1"]), ("W2", params["W2"]), ("W3", params["W3"]),
         ("Wr1a", params["Wr1a"]), ("Wr1b", 0.3 * params["Wr1b"]),
         ("Wr2", params["Wr2"]), ("Bflat", bflat)],
        jnp.bfloat16, row_align=16)
    # one f32 slab for biases / LayerNorm params (VPU path stays f32)
    pslab, poff = _pack_slab(
        [("b1", params["b1"]), ("b2", params["b2"]), ("b3", params["b3"]),
         ("gamma", params["gamma"]), ("beta", params["beta"]),
         ("br1", params["br1"]), ("br2", params["br2"])],
        jnp.float32, row_align=8)

    kernel = _make_kernel(B, tile_n, C, H, woff, poff)

    Hr = params["Wr2"].shape[0]
    flops = (2 * B * Np * (3 * H + H * H) + 2 * B * (H * L + L * Hr)
             + 2 * C * 9 * Hr + 2 * B * C * Hr * 6)
    bytes_accessed = ((q.size + m.size + inv_cnt.size) * 4
                      + wslab.size * 2 + pslab.size * 4
                      + (B * L + B * C * 9) * 4)

    z, r9 = pl.pallas_call(
        kernel,
        out_shape=(jax.ShapeDtypeStruct((B, L), jnp.float32),
                   jax.ShapeDtypeStruct((B * C, 9), jnp.float32)),
        grid=(num_tiles,),
        in_specs=[
            pl.BlockSpec((B, tile_n, 3), lambda n: (0, n, 0)),   # Q tile
            pl.BlockSpec((B, tile_n, 1), lambda n: (0, n, 0)),   # mask tile
            pl.BlockSpec((B, 1), lambda n: (0, 0)),              # 1 / count
            pl.BlockSpec(wslab.shape, lambda n: (0, 0)),         # bf16 weight slab
            pl.BlockSpec(pslab.shape, lambda n: (0, 0)),         # f32 bias/LN slab
        ],
        out_specs=(
            pl.BlockSpec((B, L), lambda n: (0, 0)),
            pl.BlockSpec((B * C, 9), lambda n: (0, 0)),
        ),
        scratch_shapes=[pltpu.VMEM((B, H), jnp.float32)],        # pooled accumulator
        compiler_params=pltpu.CompilerParams(
            dimension_semantics=("arbitrary",),                  # accumulation axis
            vmem_limit_bytes=32 * 1024 * 1024),
        cost_estimate=pl.CostEstimate(flops=flops,
                                      transcendentals=B + 4 * B * C,
                                      bytes_accessed=bytes_accessed),
        interpret=interpret,
    )(q, m, inv_cnt, wslab, pslab)

    R = r9.reshape(B, C, 3, 3)
    return R, params["B_candidates"], z


# --------------------- pure-JAX reference (same bf16 rounding) --------------- #
def qtor_reference(params, Q_batch, mask=None):
    f32, bf16 = jnp.float32, jnp.bfloat16
    B, N, _ = Q_batch.shape
    C = params["B_candidates"].shape[0]
    if mask is None:
        mask = jnp.ones((B, N), f32)
    else:
        mask = mask.astype(f32)
    bf = lambda x: x.astype(bf16)
    q = bf(Q_batch.reshape(B * N, 3).astype(f32))
    h1 = jnp.maximum(jnp.dot(q, bf(params["W1"]), preferred_element_type=f32)
                     + params["b1"], 0.0)
    h2 = jnp.maximum(jnp.dot(bf(h1), bf(params["W2"]), preferred_element_type=f32)
                     + params["b2"], 0.0)
    pooled = jnp.sum(h2.reshape(B, N, -1) * mask[:, :, None], axis=1)
    pooled = pooled / jnp.maximum(jnp.sum(mask, axis=1, keepdims=True), 1.0)
    z = jnp.dot(bf(pooled), bf(params["W3"]), preferred_element_type=f32) + params["b3"]
    mu = jnp.mean(z, axis=1, keepdims=True)
    var = jnp.mean((z - mu) ** 2, axis=1, keepdims=True)
    zn = (z - mu) * jax.lax.rsqrt(var + 1e-5) * params["gamma"] + params["beta"]
    t_z = jnp.dot(bf(zn), bf(params["Wr1a"]), preferred_element_type=f32)
    bflat = params["B_candidates"].reshape(C, 9)
    t_b = (jnp.dot(bf(bflat), bf(0.3 * params["Wr1b"]), preferred_element_type=f32)
           + params["br1"])
    h = jnp.maximum(t_z[:, None, :] + t_b[None, :, :], 0.0).reshape(B * C, -1)
    out6 = jnp.dot(bf(h), bf(params["Wr2"]), preferred_element_type=f32) + params["br2"]
    a1, a2 = out6[:, 0:3], out6[:, 3:6]
    e1 = a1 * jax.lax.rsqrt(jnp.sum(a1 * a1, axis=1, keepdims=True) + 1e-8)
    u2 = a2 - jnp.sum(e1 * a2, axis=1, keepdims=True) * e1
    e2 = u2 * jax.lax.rsqrt(jnp.sum(u2 * u2, axis=1, keepdims=True) + 1e-8)
    e3 = jnp.cross(e1, e2)
    R = jnp.concatenate([e1, e2, e3], axis=1).reshape(B, C, 3, 3)
    return R, params["B_candidates"], z


if __name__ == "__main__":
    B, N, C = 2, 16, 2         # batch, reciprocal vectors per sample, candidates
    H, L, Hr = 64, 32, 64      # encoder_hidden, latent_dim, rotation_hidden (small)

    root = jax.random.PRNGKey(0)
    kp, kq = jax.random.split(root)
    params = init_params(kp, H=H, L=L, Hr=Hr, C=C)
    Q_batch = jax.random.normal(kq, (B, N, 3), jnp.float32)

    R, B_cand, z = qtor_forward(params, Q_batch, tile_n=8)
    jax.block_until_ready((R, B_cand, z))

    # shape / sanity checks
    assert R.shape == (B, C, 3, 3)
    assert B_cand.shape == (C, 3, 3)
    assert z.shape == (B, L)
    assert bool(jnp.all(jnp.isfinite(R))) and bool(jnp.all(jnp.isfinite(z)))

    # rows of each R must be orthonormal (Gram-Schmidt output)
    rrT = jnp.einsum("bcij,bckj->bcik", R, R)
    assert bool(jnp.allclose(rrT, jnp.eye(3), atol=1e-4))

    # numerical check against a pure-JAX reference with matching bf16 rounding
    R_ref, _, z_ref = qtor_reference(params, Q_batch)
    assert bool(jnp.allclose(z, z_ref, atol=2e-3, rtol=2e-3))
    assert bool(jnp.allclose(R, R_ref, atol=2e-3, rtol=2e-3))

    print("KERNEL_OK")
</pallas_src>

<mosaic_0001>
module attributes {stable_mosaic.version = 11 : i64} {
  func.func @kernel(%arg0: i32, %arg1: memref<2x8x3xf32, #tpu.memory_space<vmem>>, %arg2: memref<2x8x1xf32, #tpu.memory_space<vmem>>, %arg3: memref<2x1xf32, #tpu.memory_space<vmem>>, %arg4: memref<272x128xbf16, #tpu.memory_space<vmem>>, %arg5: memref<56x128xf32, #tpu.memory_space<vmem>>, %arg6: memref<2x32xf32, #tpu.memory_space<vmem>>, %arg7: memref<4x9xf32, #tpu.memory_space<vmem>>, %arg8: memref<2x64xf32, #tpu.memory_space<vmem>>) attributes {dimension_semantics = [#tpu.dimension_semantics<arbitrary>], iteration_bounds = array<i64: 2>, scalar_prefetch = 0 : i64, scratch_operands = 1 : i64, tpu.core_type = #tpu.core_type<tc>, window_params = [{transform_indices = @transform_0, window_bounds = array<i64: 2, 8, 3>}, {transform_indices = @transform_1, window_bounds = array<i64: 2, 8, 1>}, {pipeline_mode = #tpu.pipeline_mode<synchronous>, transform_indices = @transform_2, window_bounds = array<i64: 2, 1>}, {pipeline_mode = #tpu.pipeline_mode<synchronous>, transform_indices = @transform_3, window_bounds = array<i64: 272, 128>}, {pipeline_mode = #tpu.pipeline_mode<synchronous>, transform_indices = @transform_4, window_bounds = array<i64: 56, 128>}, {pipeline_mode = #tpu.pipeline_mode<synchronous>, transform_indices = @transform_5, window_bounds = array<i64: 2, 32>}, {pipeline_mode = #tpu.pipeline_mode<synchronous>, transform_indices = @transform_6, window_bounds = array<i64: 4, 9>}]} {
    %c0_i32 = arith.constant 0 : i32
    %0 = arith.cmpi eq, %arg0, %c0_i32 : i32
    %1 = arith.extui %0 : i1 to i32
    %c0_i32_0 = arith.constant 0 : i32
    %2 = arith.cmpi ne, %1, %c0_i32_0 : i32
    scf.if %2 {
      %cst_21 = arith.constant 0.000000e+00 : f32
      %32 = vector.broadcast %cst_21 : f32 to vector<2x64xf32>
      %c0_22 = arith.constant 0 : index
      %c0_23 = arith.constant 0 : index
      %33 = vector.load %arg8[%c0_22, %c0_23] : memref<2x64xf32, #tpu.memory_space<vmem>>, vector<2x64xf32>
      tpu.vector_store %arg8[%c0_22, %c0_23], %32 {strides = array<i32>} : memref<2x64xf32, #tpu.memory_space<vmem>>, vector<2x64xf32>,
    } else {
    }
    %c0 = arith.constant 0 : index
    %c0_1 = arith.constant 0 : index
    %c0_2 = arith.constant 0 : index
    %3 = vector.load %arg1[%c0, %c0_1, %c0_2] : memref<2x8x3xf32, #tpu.memory_space<vmem>>, vector<2x8x3xf32>
    %4 = vector.shape_cast %3 : vector<2x8x3xf32> to vector<16x3xf32>
    %5 = arith.truncf %4 : vector<16x3xf32> to vector<16x3xbf16>
    %c0_3 = arith.constant 0 : index
    %c0_4 = arith.constant 0 : index
    %6 = vector.load %arg4[%c0_3, %c0_4] : memref<272x128xbf16, #tpu.memory_space<vmem>>, vector<3x64xbf16>
    %cst = arith.constant dense<0.000000e+00> : vector<16x64xf32>
    %7 = tpu.matmul %5, %6, %cst {dimension_numbers = #tpu.dot_dimension_numbers<[1], [0], [0], [1], [0, 0, 1, 1], [], []>} : vector<16x3xbf16>, vector<3x64xbf16>, vector<16x64xf32> -> vector<16x64xf32>
    %c0_5 = arith.constant 0 : index
    %c0_6 = arith.constant 0 : index
    %8 = vector.load %arg5[%c0_5, %c0_6] : memref<56x128xf32, #tpu.memory_space<vmem>>, vector<1x64xf32>
    %9 = vector.broadcast %8 : vector<1x64xf32> to vector<16x64xf32>
    %10 = arith.addf %7, %9 : vector<16x64xf32>
    %cst_7 = arith.constant 0.000000e+00 : f32
    %11 = vector.broadcast %cst_7 : f32 to vector<16x64xf32>
    %12 = arith.maximumf %10, %11 : vector<16x64xf32>
    %13 = arith.truncf %12 : vector<16x64xf32> to vector<16x64xbf16>
    %c16 = arith.constant 16 : index
    %c0_8 = arith.constant 0 : index
    %14 = vector.load %arg4[%c16, %c0_8] : memref<272x128xbf16, #tpu.memory_space<vmem>>, vector<64x64xbf16>
    %cst_9 = arith.constant dense<0.000000e+00> : vector<16x64xf32>
    %15 = tpu.matmul %13, %14, %cst_9 {dimension_numbers = #tpu.dot_dimension_numbers<[1], [0], [0], [1], [0, 0, 1, 1], [], []>} : vector<16x64xbf16>, vector<64x64xbf16>, vector<16x64xf32> -> vector<16x64xf32>
    %c8 = arith.constant 8 : index
    %c0_10 = arith.constant 0 : index
    %16 = vector.load %arg5[%c8, %c0_10] : memref<56x128xf32, #tpu.memory_space<vmem>>, vector<1x64xf32>
    %17 = vector.broadcast %16 : vector<1x64xf32> to vector<16x64xf32>
    %18 = arith.addf %15, %17 : vector<16x64xf32>
    %cst_11 = arith.constant 0.000000e+00 : f32
    %19 = vector.broadcast %cst_11 : f32 to vector<16x64xf32>
    %20 = arith.maximumf %18, %19 : vector<16x64xf32>
    %c0_12 = arith.constant 0 : index
    %c0_13 = arith.constant 0 : index
    %21 = vector.load %arg8[%c0_12, %c0_13] : memref<2x64xf32, #tpu.memory_space<vmem>>, vector<2x64xf32>
    %22 = vector.shape_cast %20 : vector<16x64xf32> to vector<2x8x64xf32>
    %c0_14 = arith.constant 0 : index
    %c0_15 = arith.constant 0 : index
    %c0_16 = arith.constant 0 : index
    %23 = vector.load %arg2[%c0_14, %c0_15, %c0_16] : memref<2x8x1xf32, #tpu.memory_space<vmem>>, vector<2x8x1xf32>
    %24 = vector.broadcast %23 : vector<2x8x1xf32> to vector<2x8x64xf32>
    %25 = arith.mulf %22, %24 : vector<2x8x64xf32>
    %cst_17 = arith.constant dense<0.000000e+00> : vector<2x64xf32>
    %26 = vector.multi_reduction <add>, %25, %cst_17 [1] : vector<2x8x64xf32> to vector<2x64xf32>
    %27 = arith.addf %21, %26 : vector<2x64xf32>
    %c0_18 = arith.constant 0 : index
    %c0_19 = arith.constant 0 : index
    %28 = vector.load %arg8[%c0_18, %c0_19] : memref<2x64xf32, #tpu.memory_space<vmem>>, vector<2x64xf32>
    tpu.vector_store %arg8[%c0_18, %c0_19], %27 {strides = array<i32>} : memref<2x64xf32, #tpu.memory_space<vmem>>, vector<2x64xf32>,
    %c1_i32 = arith.constant 1 : i32
    %29 = arith.cmpi eq, %arg0, %c1_i32 : i32
    %30 = arith.extui %29 : i1 to i32
    %c0_i32_20 = arith.constant 0 : i32
    %31 = arith.cmpi ne, %30, %c0_i32_20 : i32
    scf.if %31 {
      %c0_21 = arith.constant 0 : index
      %c0_22 = arith.constant 0 : index
      %32 = vector.load %arg8[%c0_21, %c0_22] : memref<2x64xf32, #tpu.memory_space<vmem>>, vector<2x64xf32>
      %c0_23 = arith.constant 0 : index
      %c0_24 = arith.constant 0 : index
      %33 = vector.load %arg3[%c0_23, %c0_24] : memref<2x1xf32, #tpu.memory_space<vmem>>, vector<2x1xf32>
      %34 = vector.broadcast %33 : vector<2x1xf32> to vector<2x64xf32>
      %35 = arith.mulf %32, %34 : vector<2x64xf32>
      %36 = arith.truncf %35 : vector<2x64xf32> to vector<2x64xbf16>
      %c80 = arith.constant 80 : index
      %c0_25 = arith.constant 0 : index
      %37 = vector.load %arg4[%c80, %c0_25] : memref<272x128xbf16, #tpu.memory_space<vmem>>, vector<64x32xbf16>
      %cst_26 = arith.constant dense<0.000000e+00> : vector<2x32xf32>
      %38 = tpu.matmul %36, %37, %cst_26 {dimension_numbers = #tpu.dot_dimension_numbers<[1], [0], [0], [1], [0, 0, 1, 1], [], []>} : vector<2x64xbf16>, vector<64x32xbf16>, vector<2x32xf32> -> vector<2x32xf32>
      %c16_27 = arith.constant 16 : index
      %c0_28 = arith.constant 0 : index
      %39 = vector.load %arg5[%c16_27, %c0_28] : memref<56x128xf32, #tpu.memory_space<vmem>>, vector<1x32xf32>
      %40 = vector.broadcast %39 : vector<1x32xf32> to vector<2x32xf32>
      %41 = arith.addf %38, %40 : vector<2x32xf32>
      %c0_29 = arith.constant 0 : index
      %c0_30 = arith.constant 0 : index
      %42 = vector.load %arg6[%c0_29, %c0_30] : memref<2x32xf32, #tpu.memory_space<vmem>>, vector<2x32xf32>
      tpu.vector_store %arg6[%c0_29, %c0_30], %41 {strides = array<i32>} : memref<2x32xf32, #tpu.memory_space<vmem>>, vector<2x32xf32>,
      %cst_31 = arith.constant dense<0.000000e+00> : vector<2xf32>
      %43 = vector.multi_reduction <add>, %41, %cst_31 [1] : vector<2x32xf32> to vector<2xf32>
      %44 = vector.shape_cast %43 : vector<2xf32> to vector<2x1xf32>
      %cst_32 = arith.constant 3.200000e+01 : f32
      %45 = vector.broadcast %cst_32 : f32 to vector<2x1xf32>
      %46 = arith.divf %44, %45 : vector<2x1xf32>
      %47 = vector.broadcast %46 : vector<2x1xf32> to vector<2x32xf32>
      %48 = arith.subf %41, %47 : vector<2x32xf32>
      %49 = arith.mulf %48, %48 : vector<2x32xf32>
      %cst_33 = arith.constant dense<0.000000e+00> : vector<2xf32>
      %50 = vector.multi_reduction <add>, %49, %cst_33 [1] : vector<2x32xf32> to vector<2xf32>
      %51 = vector.shape_cast %50 : vector<2xf32> to vector<2x1xf32>
      %cst_34 = arith.constant 3.200000e+01 : f32
      %52 = vector.broadcast %cst_34 : f32 to vector<2x1xf32>
      %53 = arith.divf %51, %52 : vector<2x1xf32>
      %54 = vector.broadcast %46 : vector<2x1xf32> to vector<2x32xf32>
      %55 = arith.subf %41, %54 : vector<2x32xf32>
      %cst_35 = arith.constant 9.99999974E-6 : f32
      %56 = vector.broadcast %cst_35 : f32 to vector<2x1xf32>
      %57 = arith.addf %53, %56 : vector<2x1xf32>
      %58 = math.rsqrt %57 : vector<2x1xf32>
      %59 = vector.broadcast %58 : vector<2x1xf32> to vector<2x32xf32>
      %60 = arith.mulf %55, %59 : vector<2x32xf32>
      %c24 = arith.constant 24 : index
      %c0_36 = arith.constant 0 : index
      %61 = vector.load %arg5[%c24, %c0_36] : memref<56x128xf32, #tpu.memory_space<vmem>>, vector<1x32xf32>
      %62 = vector.broadcast %61 : vector<1x32xf32> to vector<2x32xf32>
      %63 = arith.mulf %60, %62 : vector<2x32xf32>
      %c32 = arith.constant 32 : index
      %c0_37 = arith.constant 0 : index
      %64 = vector.load %arg5[%c32, %c0_37] : memref<56x128xf32, #tpu.memory_space<vmem>>, vector<1x32xf32>
      %65 = vector.broadcast %64 : vector<1x32xf32> to vector<2x32xf32>
      %66 = arith.addf %63, %65 : vector<2x32xf32>
      %67 = arith.truncf %66 : vector<2x32xf32> to vector<2x32xbf16>
      %c144 = arith.constant 144 : index
      %c0_38 = arith.constant 0 : index
      %68 = vector.load %arg4[%c144, %c0_38] : memref<272x128xbf16, #tpu.memory_space<vmem>>, vector<32x64xbf16>
      %cst_39 = arith.constant dense<0.000000e+00> : vector<2x64xf32>
      %69 = tpu.matmul %67, %68, %cst_39 {dimension_numbers = #tpu.dot_dimension_numbers<[1], [0], [0], [1], [0, 0, 1, 1], [], []>} : vector<2x32xbf16>, vector<32x64xbf16>, vector<2x64xf32> -> vector<2x64xf32>
      %c256 = arith.constant 256 : index
      %c0_40 = arith.constant 0 : index
      %70 = vector.load %arg4[%c256, %c0_40] : memref<272x128xbf16, #tpu.memory_space<vmem>>, vector<2x9xbf16>
      %c176 = arith.constant 176 : index
      %c0_41 = arith.constant 0 : index
      %71 = vector.load %arg4[%c176, %c0_41] : memref<272x128xbf16, #tpu.memory_space<vmem>>, vector<9x64xbf16>
      %cst_42 = arith.constant dense<0.000000e+00> : vector<2x64xf32>
      %72 = tpu.matmul %70, %71, %cst_42 {dimension_numbers = #tpu.dot_dimension_numbers<[1], [0], [0], [1], [0, 0, 1, 1], [], []>} : vector<2x9xbf16>, vector<9x64xbf16>, vector<2x64xf32> -> vector<2x64xf32>
      %c40 = arith.constant 40 : index
      %c0_43 = arith.constant 0 : index
      %73 = vector.load %arg5[%c40, %c0_43] : memref<56x128xf32, #tpu.memory_space<vmem>>, vector<1x64xf32>
      %74 = vector.broadcast %73 : vector<1x64xf32> to vector<2x64xf32>
      %75 = arith.addf %72, %74 : vector<2x64xf32>
      %76 = vector.extract_strided_slice %69 {offsets = [0, 0], sizes = [1, 64], strides = [1, 1]} : vector<2x64xf32> to vector<1x64xf32>
      %77 = vector.broadcast %76 : vector<1x64xf32> to vector<2x64xf32>
      %78 = arith.addf %77, %75 : vector<2x64xf32>
      %cst_44 = arith.constant 0.000000e+00 : f32
      %79 = vector.broadcast %cst_44 : f32 to vector<2x64xf32>
      %80 = arith.maximumf %78, %79 : vector<2x64xf32>
      %81 = vector.extract_strided_slice %69 {offsets = [1, 0], sizes = [1, 64], strides = [1, 1]} : vector<2x64xf32> to vector<1x64xf32>
      %82 = vector.broadcast %81 : vector<1x64xf32> to vector<2x64xf32>
      %83 = arith.addf %82, %75 : vector<2x64xf32>
      %cst_45 = arith.constant 0.000000e+00 : f32
      %84 = vector.broadcast %cst_45 : f32 to vector<2x64xf32>
      %85 = arith.maximumf %83, %84 : vector<2x64xf32>
      %86 = tpu.concatenate %80, %85 in 0 : vector<2x64xf32>, vector<2x64xf32> -> vector<4x64xf32>
      %87 = arith.truncf %86 : vector<4x64xf32> to vector<4x64xbf16>
      %c192 = arith.constant 192 : index
      %c0_46 = arith.constant 0 : index
      %88 = vector.load %arg4[%c192, %c0_46] : memref<272x128xbf16, #tpu.memory_space<vmem>>, vector<64x6xbf16>
      %cst_47 = arith.constant dense<0.000000e+00> : vector<4x6xf32>
      %89 = tpu.matmul %87, %88, %cst_47 {dimension_numbers = #tpu.dot_dimension_numbers<[1], [0], [0], [1], [0, 0, 1, 1], [], []>} : vector<4x64xbf16>, vector<64x6xbf16>, vector<4x6xf32> -> vector<4x6xf32>
      %c48 = arith.constant 48 : index
      %c0_48 = arith.constant 0 : index
      %90 = vector.load %arg5[%c48, %c0_48] : memref<56x128xf32, #tpu.memory_space<vmem>>, vector<1x6xf32>
      %91 = vector.broadcast %90 : vector<1x6xf32> to vector<4x6xf32>
      %92 = arith.addf %89, %91 : vector<4x6xf32>
      %93 = vector.extract_strided_slice %92 {offsets = [0, 0], sizes = [4, 3], strides = [1, 1]} : vector<4x6xf32> to vector<4x3xf32>
      %94 = vector.extract_strided_slice %92 {offsets = [0, 3], sizes = [4, 3], strides = [1, 1]} : vector<4x6xf32> to vector<4x3xf32>
      %95 = arith.mulf %93, %93 : vector<4x3xf32>
      %cst_49 = arith.constant dense<0.000000e+00> : vector<4xf32>
      %96 = vector.multi_reduction <add>, %95, %cst_49 [1] : vector<4x3xf32> to vector<4xf32>
      %97 = vector.shape_cast %96 : vector<4xf32> to vector<4x1xf32>
      %cst_50 = arith.constant 9.99999993E-9 : f32
      %98 = vector.broadcast %cst_50 : f32 to vector<4x1xf32>
      %99 = arith.addf %97, %98 : vector<4x1xf32>
      %100 = math.rsqrt %99 : vector<4x1xf32>
      %101 = vector.broadcast %100 : vector<4x1xf32> to vector<4x3xf32>
      %102 = arith.mulf %93, %101 : vector<4x3xf32>
      %103 = arith.mulf %102, %94 : vector<4x3xf32>
      %cst_51 = arith.constant dense<0.000000e+00> : vector<4xf32>
      %104 = vector.multi_reduction <add>, %103, %cst_51 [1] : vector<4x3xf32> to vector<4xf32>
      %105 = vector.shape_cast %104 : vector<4xf32> to vector<4x1xf32>
      %106 = vector.broadcast %105 : vector<4x1xf32> to vector<4x3xf32>
      %107 = arith.mulf %106, %102 : vector<4x3xf32>
      %108 = arith.subf %94, %107 : vector<4x3xf32>
      %109 = arith.mulf %108, %108 : vector<4x3xf32>
      %cst_52 = arith.constant dense<0.000000e+00> : vector<4xf32>
      %110 = vector.multi_reduction <add>, %109, %cst_52 [1] : vector<4x3xf32> to vector<4xf32>
      %111 = vector.shape_cast %110 : vector<4xf32> to vector<4x1xf32>
      %cst_53 = arith.constant 9.99999993E-9 : f32
      %112 = vector.broadcast %cst_53 : f32 to vector<4x1xf32>
      %113 = arith.addf %111, %112 : vector<4x1xf32>
      %114 = math.rsqrt %113 : vector<4x1xf32>
      %115 = vector.broadcast %114 : vector<4x1xf32> to vector<4x3xf32>
      %116 = arith.mulf %108, %115 : vector<4x3xf32>
      %117 = vector.extract_strided_slice %102 {offsets = [0, 0], sizes = [4, 1], strides = [1, 1]} : vector<4x3xf32> to vector<4x1xf32>
      %118 = vector.extract_strided_slice %102 {offsets = [0, 1], sizes = [4, 1], strides = [1, 1]} : vector<4x3xf32> to vector<4x1xf32>
      %119 = vector.extract_strided_slice %102 {offsets = [0, 2], sizes = [4, 1], strides = [1, 1]} : vector<4x3xf32> to vector<4x1xf32>
      %120 = vector.extract_strided_slice %116 {offsets = [0, 0], sizes = [4, 1], strides = [1, 1]} : vector<4x3xf32> to vector<4x1xf32>
      %121 = vector.extract_strided_slice %116 {offsets = [0, 1], sizes = [4, 1], strides = [1, 1]} : vector<4x3xf32> to vector<4x1xf32>
      %122 = vector.extract_strided_slice %116 {offsets = [0, 2], sizes = [4, 1], strides = [1, 1]} : vector<4x3xf32> to vector<4x1xf32>
      %123 = arith.mulf %118, %122 : vector<4x1xf32>
      %124 = arith.mulf %119, %121 : vector<4x1xf32>
      %125 = arith.subf %123, %124 : vector<4x1xf32>
      %126 = arith.mulf %119, %120 : vector<4x1xf32>
      %127 = arith.mulf %117, %122 : vector<4x1xf32>
      %128 = arith.subf %126, %127 : vector<4x1xf32>
      %129 = arith.mulf %117, %121 : vector<4x1xf32>
      %130 = arith.mulf %118, %120 : vector<4x1xf32>
      %131 = arith.subf %129, %130 : vector<4x1xf32>
      %132 = tpu.concatenate %125, %128, %131 in 1 : vector<4x1xf32>, vector<4x1xf32>, vector<4x1xf32> -> vector<4x3xf32>
      %133 = tpu.concatenate %102, %116, %132 in 1 : vector<4x3xf32>, vector<4x3xf32>, vector<4x3xf32> -> vector<4x9xf32>
      %c0_54 = arith.constant 0 : index
      %c0_55 = arith.constant 0 : index
      %134 = vector.load %arg7[%c0_54, %c0_55] : memref<4x9xf32, #tpu.memory_space<vmem>>, vector<4x9xf32>
      tpu.vector_store %arg7[%c0_54, %c0_55], %133 {strides = array<i32>} : memref<4x9xf32, #tpu.memory_space<vmem>>, vector<4x9xf32>,
    } else {
    }
    return
  }
  func.func @transform_0(%arg0: i32) -> (i32, i32, i32) {
    %c0_i32 = arith.constant 0 : i32
    %c0_i32_0 = arith.constant 0 : i32
    %c0_i32_1 = arith.constant 0 : i32
    return %c0_i32, %arg0, %c0_i32_0 : i32, i32, i32
  }
  func.func @transform_1(%arg0: i32) -> (i32, i32, i32) {
    %c0_i32 = arith.constant 0 : i32
    %c0_i32_0 = arith.constant 0 : i32
    %c0_i32_1 = arith.constant 0 : i32
    return %c0_i32, %arg0, %c0_i32_0 : i32, i32, i32
  }
  func.func @transform_2(%arg0: i32) -> (i32, i32) {
    %c0_i32 = arith.constant 0 : i32
    %c0_i32_0 = arith.constant 0 : i32
    %c0_i32_1 = arith.constant 0 : i32
    return %c0_i32, %c0_i32_0 : i32, i32
  }
  func.func @transform_3(%arg0: i32) -> (i32, i32) {
    %c0_i32 = arith.constant 0 : i32
    %c0_i32_0 = arith.constant 0 : i32
    %c0_i32_1 = arith.constant 0 : i32
    return %c0_i32, %c0_i32_0 : i32, i32
  }
  func.func @transform_4(%arg0: i32) -> (i32, i32) {
    %c0_i32 = arith.constant 0 : i32
    %c0_i32_0 = arith.constant 0 : i32
    %c0_i32_1 = arith.constant 0 : i32
    return %c0_i32, %c0_i32_0 : i32, i32
  }
  func.func @transform_5(%arg0: i32) -> (i32, i32) {
    %c0_i32 = arith.constant 0 : i32
    %c0_i32_0 = arith.constant 0 : i32
    %c0_i32_1 = arith.constant 0 : i32
    return %c0_i32, %c0_i32_0 : i32, i32
  }
  func.func @transform_6(%arg0: i32) -> (i32, i32) {
    %c0_i32 = arith.constant 0 : i32
    %c0_i32_0 = arith.constant 0 : i32
    %c0_i32_1 = arith.constant 0 : i32
    return %c0_i32, %c0_i32_0 : i32, i32
  }
}

</mosaic_0001>

<bundles_post_ra>
// kernel: tpu_custom_call.1
= control target key start
LH: loop header
LB: loop body
LE: loop exit
PB: predicated region body
PF: predicated region fallthrough
CT: control target
= control target key end

     0   :  { %12 = vsyncpa [#allocation6], 0  ;;  %s1670_s0 = inlined_call_operand.vmem [shape: f32[2,16,3], index: 0, kind: input, shape index: {}]   ;;  %s1671_s1 = inlined_call_operand.vmem [shape: f32[2,16,1], index: 1, kind: input, shape index: {}]   ;;  %s1672_s2 = inlined_call_operand.vmem [shape: f32[2,1], index: 2, kind: input, shape index: {}]   ;;  %s1673_s3 = inlined_call_operand.hbm [shape: bf16[272,128], index: 3, kind: input, shape index: {}]   ;;  %s1674_s4 = inlined_call_operand.vmem [shape: f32[56,128], index: 4, kind: input, shape index: {}]   ;;  %s1675_s5 = inlined_call_operand.hbm [shape: f32[2,32], index: 5, kind: output, shape index: {0}]   ;;  %s1676_s6 = inlined_call_operand.hbm [shape: f32[4,9], index: 6, kind: output, shape index: {1}]  }
   0x1   :  { %13 = vsyncpa [#allocation7], 0 }
   0x2   :  { %14 = vsyncpa [#allocation10], 0  ;;  %s1461_s21 = smov 0   ;;  %s1463_s22 = smov 0  }
   0x3   :  { %s1465_s23 = smov 0  }
   0x4 LB: > { %s1477_s24 = sadd.s32 4294967295, %s1402_s23   ;;  %s1480_s25 = sadd.s32 1, %s1402_s23   ;;  %s1402_s23 = sphi %s1465_s23, %s1690_s23   ;;  %s1398_s22 = sphi %s1463_s22, %s1689_s22   ;;  %s1394_s21 = sphi %s1461_s21, %s1688_s21  }
   0x5   : > { %s24_s26 = ssub.s32 %s1402_s23, %s1480_s25  ;;  %s27_s27 = sadd.s32 1, %s1398_s22 }
   0x6   : > { %p25_p0 = scmp.eq.s32.totalorder %s24_s26, 0  ;;  %p34_p1 = scmp.ne.s32.totalorder %s1398_s22, %s1394_s21 }
   0x7   : > { %p35_p2 = scmp.eq.s32.totalorder %s1402_s23, 0  ;;  %p1072_p3 = scmp.ge.s32.totalorder %s1402_s23, 1 }
   0x8   : > { %s1490_s28 = scalar_select %p25_p0, %s1398_s22, %s27_s27  }
   0x9   : > { %p1492_p4 = por %p35_p2, %p34_p1  ;;  %p182_p5 = scmp.lt.s32.totalorder %s1402_s23, 3 }
   0xa   : > { %p1677_p7 = scmp.eq.s32.totalorder %s1477_s24, 0  ;;  %s1404_s7 = smov [#allocation5]  }
   0xb   : > { %s1679_s29 = scalar_select %p1492_p4, 1, 0 }
   0xc   : > { %p1499_p8 = pnand %p1072_p3, %p182_p5  ;;  %s197_s8 = sshll.u32 %s1404_s7, 4  ;;  %s198_s8 = int_to_ptr.vmem [resolvable:$true] %s197_s8 }
   0xd   : > { %s1288_s12 = scalar_lea.hbm %s1673_s3, 2176 }
   0xe   : > { %s1680_s30 = scalar_select %p1499_p8, 1, 0 }
   0xf   : > { %p1209_p9 = pneg %p1499_p8  ;;  %p1289_p11 = scmp.ne.s32.totalorder %s1673_s3, %s1288_s12 }
  0x10   : > { %p1295_p1 = scmp.lt.u32.totalorder %s1288_s12, %s1673_s3 }
  0x11   : > { %p1507_p10 = pnand %p1677_p7, %p1209_p9 }
  0x13   : > { %p1290_p12 = pneg %p1507_p10 }
  0x15   : > { %p1291_p13 = pnand %p1290_p12, %p1289_p11 }
  0x17   : > { %p1292_p0 = pneg %p1291_p13 }
  0x19   : > { %p1297_p2 = pnand %p1295_p1, %p1292_p0 }
  0x1b   : > { %1300 = shalt.err (!%p1297_p2)
}
  0x1c   : > { %s1301_s17 = scalar_lea.vmem %s198_s8, 2176  ;;  %p1309_p6 = scmp.lt.s32.totalorder %s198_s8, %s198_s8 }
  0x1d   : > { %p1302_p3 = scmp.ne.s32.totalorder %s198_s8, %s1301_s17  ;;  %p1310_p7 = scmp.lt.s32.totalorder %s1301_s17, %s1301_s17 }
  0x1f   : > { %p1304_p5 = pnand %p1302_p3, %p1290_p12  ;;  %p1311_p8 = por %p1310_p7, %p1309_p6 }
  0x21   : > { %p1305_p9 = pneg %p1304_p5 }
  0x23   : > { %p1312_p4 = pnand %p1311_p8, %p1305_p9 }
  0x25   : > { %1315 = shalt.err (!%p1312_p4)
}
  0x26   : > { %s1405_s18 = smov 64   ;;  %s1406_s19 = smov 4  }
  0x27   : > { %1212 = dma.hbm_to_vmem [thread:$0]  (!%p1507_p10), %s1673_s3, 2176, %s198_s8, [#allocation6], %s1405_s18, %s1405_s18, %s1406_s19  }
  0x28   : > { %p1074_p11 = scmp.ge.s32.totalorder %s1402_s23, 2 }
  0x29   : > { %p1682_p13 = scmp.ne.s32.totalorder (!%p1074_p11), %s1679_s29, 0 }
  0x2a   : > { %210 = sbr.rel (%p1074_p11) target bundleno = 65 (0x41), region = 28 }
  0x31   : > { %213 = sbr.rel (!%p1682_p13) target bundleno = 56 (0x38), region = 32  ;;  %s215_s27 = sand.u32 (%p1682_p13), 1, %s1398_s22  }
  0x32   : > { %s1076_s7 = sshll.u32 (%p1682_p13), %s1402_s23, 3  ;;  %s1075_s10 = sshll.u32 (%p1682_p13), %s215_s27, 4 }
  0x33   : > { %s219_s13 = scalar_lea.vmem (%p1682_p13), %s1670_s0, %s1076_s7  ;;  %s217_s9 = scalar_lea.vmem (%p1682_p13), [#allocation3], %s1075_s10 }
  0x34   : > { %v249_v0 = vld [vmem:[%s219_s13] sm:$0xff] (%p1682_p13)  ;;  %v251_v1 = vld [vmem:[%s219_s13 + $0x10] sm:$0xff] (%p1682_p13) }
  0x35   : > { %250 = vst [vmem:[%s217_s9] sm:$0xff] (%p1682_p13), %v249_v0  ;;  %252 = vst [vmem:[%s217_s9 + $0x8] sm:$0xff] (%p1682_p13), %v251_v1 }
  0x38 PF: > { %p1683_p4 = scmp.ne.s32.totalorder %s1679_s29, 0 }
  0x39   : > { %s260_s8 = sand.u32 (%p1683_p4), 1, %s1398_s22   ;;  %s1078_s14 = sshll.u32 (%p1683_p4), %s1402_s23, 3 }
  0x3a   : > { %258 = sbr.rel (!%p1683_p4) target bundleno = 65 (0x41), region = 70  ;;  %s1077_s15 = sshll.u32 (%p1683_p4), %s260_s8, 4 }
  0x3b   : > { %s264_s18 = scalar_lea.vmem (%p1683_p4), %s1671_s1, %s1078_s14  ;;  %s262_s19 = scalar_lea.vmem (%p1683_p4), [#allocation4], %s1077_s15 }
  0x3c   : > { %v294_v2 = vld [vmem:[%s264_s18] sm:$0xff] (%p1683_p4)  ;;  %v296_v3 = vld [vmem:[%s264_s18 + $0x10] sm:$0xff] (%p1683_p4) }
  0x3d   : > { %295 = vst [vmem:[%s262_s19] sm:$0xff] (%p1683_p4), %v294_v2  ;;  %297 = vst [vmem:[%s262_s19 + $0x8] sm:$0xff] (%p1683_p4), %v296_v3 }
  0x41 PF: > { %p1684_p6 = scmp.ne.s32.totalorder %s1680_s30, 0 }
  0x42   : > { %s309_s29 = sand.u32 (!%p1684_p6), 1, %s1394_s21   ;;  %p1685_p7 = scmp.eq.s32.totalorder (!%p1684_p6), %s1477_s24, 0 }
  0x43   : > { %306 = sbr.rel (%p1684_p6) target bundleno = 2756 (0xac4), region = 108  ;;  %s1545_s20 = sshll.u32 (!%p1684_p6), %s309_s29, 4 }
  0x44   : > { %s311_s23 = scalar_lea.vmem (!%p1684_p6), [#allocation3], %s1545_s20  ;;  %s318_s26 = scalar_lea.vmem (!%p1684_p6), [#allocation4], %s1545_s20 }
  0x4a   : > { %1381 = dma.done.wait (%p1685_p7), [#allocation6], 2176   ;;  %p1686_p8 = pmov %p1685_p7 }
  0x4b   : > { %p1687_p10 = scmp.ne.s32.totalorder %s1477_s24, 0 }
  0x4c   : > { %1383 = vsyncadd (%p1686_p8), [#allocation6], 4294965120  ;;  %vm353_vm0 = vcmask (!%p1687_p10), 517120   ;;  %v1407_v4 = vmov (!%p1687_p10), 0.0  }
  0x4d   : > { %352 = sbr.rel (%p1687_p10) target bundleno = 84 (0x54), region = 124  ;;  %354 = vst.msk [vmem:[#allocation2] sm:$0x3] (!%p1687_p10), %vm353_vm0, %v1407_v4 }
  0x54 PF: > { %v358_v5 = vld [vmem:[#allocation5] sm:$0x3]  ;;  %vm368_vm1 = vcmask 1040384   ;;  %vm369_vm2 = vcmask 1041408   ;;  %v1408_v6 = vmov 0.0   ;;  %v1409_v7 = vmov 65535  }
  0x55   : > { %1141 = vmatprep.subr.bf16.mxu0 %v1408_v6  ;;  %v370_v8 = vsel %vm368_vm1, 4294967295, %v1409_v7  ;;  %v355_v9 = vld [vmem:[%s311_s23] sm:$0xff]  ;;  %v356_v10 = vld [vmem:[%s311_s23 + $0x8] sm:$0xff]  ;;  %1147 = vmatprep.subr.bf16.mxu1 %v1408_v6  ;;  %vm1410_vm3 = vmmov 0   ;;  %vm364_vm4 = vcmask 23552   ;;  %v1411_v19 = vmov 0  }
  0x56   : > { %v1266_v11 = vld [vmem:[#allocation5 + $0x8] sm:$0xff]   ;;  %v371_v12 = vsel %vm369_vm2, %v370_v8, 0  ;;  %1143 = vmatprep.mubr.msk.bf16.mxu0 %vm1410_vm3, %v1408_v6  ;;  %1155 = vmatprep.mubr.msk.bf16.mxu1 %vm1410_vm3, %v1408_v6  ;;  %v1267_v14 = vld [vmem:[#allocation5 + $0x10] sm:$0xff]   ;;  %v357_v15 = vpack.c.bf16 %v356_v10, %v355_v9  ;;  %v1268_v16 = vld [vmem:[#allocation5 + $0x18] sm:$0xff]   ;;  %vm456_vm5 = vcmask 523264   ;;  %vm534_vm6 = vcmask 1041409  }
  0x57   : > { %v373_v13 = vand.u32 %v371_v12, %v358_v5  ;;  %1148 = vmatpush3.bf16.msra.mxu1 %v1266_v11  ;;  %v1269_v17 = vld [vmem:[#allocation5 + $0x20] sm:$0xff]   ;;  %1265 = vset.pattern.permute.xlu0 %v1411_v19  ;;  %v505_v20 = vld [vmem:[%s318_s26 + $0x8] sm:$0xff]  ;;  %vm538_vm7 = vcmask 517120   ;;  %p1092_p12 = scmp.ne.s32.totalorder %s1477_s24, 1 }
  0x58   : > { %1149 = vmatprep.subr.bf16.mxu1 %v1408_v6  ;;  %v504_v18 = vld [vmem:[%s318_s26] sm:$0xff]  ;;  %v1084_v21 = vld [vmem:[%s1674_s4] ss:$0 sm:$0xff]  ;;  %v1412_v62 = vmov (!%p1092_p12), 0   ;;  %v1413_v63 = vmov (!%p1092_p12), 0.0   ;;  %v1271_v0 = vld [vmem:[#allocation5 + $0x28] sm:$0xff] (!%p1092_p12)  }
  0x59   : > { %1142 = vmatpush3.bf16.msra.mxu0 %v373_v13  ;;  %508 = vperm.xlu0 %1265, %v504_v18   ;;  %v1086_v31 = vld [vmem:[%s1674_s4 + $0x8] ss:$0 sm:$0xff]  ;;  %v503_v57 = vld [vmem:[#allocation2] sm:$0x3]  ;;  %v1272_v1 = vld [vmem:[#allocation5 + $0x30] sm:$0xff] (!%p1092_p12)   ;;  %vm1414_vm8 = vmmov (!%p1092_p12), 0  }
  0x5a   : > { %v545_v61 = vld [vmem:[%s1672_s2] sm:$0x3] (!%p1092_p12)  ;;  %1159 = vmatprep.subr.bf16.mxu0 (!%p1092_p12), %v1413_v63  ;;  %v1274_v3 = vld [vmem:[#allocation5 + $0x40] sm:$0xff] (!%p1092_p12)   ;;  %v1093_v8 = vld [vmem:[%s1674_s4 + $0x10] ss:$0 sm:$0xff] (!%p1092_p12)  ;;  %vm633_vm9 = vcmask (!%p1092_p12), 254976  }
  0x5b   : > { %1150 = vmatpush3.bf16.msra.mxu1 %v1267_v14  ;;  %v1273_v2 = vld [vmem:[#allocation5 + $0x38] sm:$0xff] (!%p1092_p12)   ;;  %vm739_vm10 = vcmask (!%p1092_p12), 1043456   ;;  %vm740_vm11 = vcmask (!%p1092_p12), 1044480   ;;  %vm678_vm12 = vcmask (!%p1092_p12), 261120   ;;  %vm735_vm13 = vcmask (!%p1092_p12), 72704   ;;  %s1416_s29 = smov (!%p1092_p12), 125  }
  0x5c   : > { %1144 = vmatmul.mubr.msk.bf16.vlgmr.msra.gmra.mrb[0].mxu0 %vm364_vm4, %v357_v15  ;;  %1151 = vmatprep.subr.bf16.mxu1 %v1408_v6  ;;  %vm884_vm14 = vcmask (!%p1092_p12), 19456   ;;  %s1417_s20 = smov (!%p1092_p12), 3   ;;  %s1418_s23 = smov (!%p1092_p12), 126   ;;  %vm954_vm15 = vcmask (!%p1092_p12), 7168   ;;  %vm956_vm0 = vcmask (!%p1092_p12), 15360   ;;  %vm963_vm1 = vcmask (!%p1092_p12), 48128  }
  0x5d   : > { %513 = vperm.xlu0 %1265, %v505_v20   ;;  %1160 = vmatpush3.bf16.msra.mxu0 (!%p1092_p12), %v1271_v0  ;;  %v1275_v20 = vld [vmem:[#allocation5 + $0x48] sm:$0xff] (!%p1092_p12)   ;;  %s1419_s26 = smov (!%p1092_p12), 123   ;;  %s1420_s21 = smov (!%p1092_p12), 124  }
  0x5e   : > { %1161 = vmatprep.subr.bf16.mxu0 (!%p1092_p12), %v1413_v63  ;;  %1167 = vmatprep.mubr.msk.bf16.mxu0 (!%p1092_p12), %vm1414_vm8, %v1413_v63  ;;  %s1421_s30 = smov (!%p1092_p12), 127   ;;  %s1422_s27 = smov (!%p1092_p12), 2  }
  0x5f   : > { %1152 = vmatpush3.bf16.msra.mxu1 %v1268_v16  ;;  %s1423_s7 = smov (!%p1092_p12), 6  }
  0x60   : > { %1153 = vmatprep.subr.bf16.mxu1 %v1408_v6 }
  0x61   : > { %1270 = vset.pattern.permute.xlu0 (!%p1092_p12), %v1412_v62  ;;  %1162 = vmatpush3.bf16.msra.mxu0 (!%p1092_p12), %v1272_v1  ;;  %v1107_v1 = vld [vmem:[%s1674_s4 + $0x30] ss:$0 sm:$0xff] (!%p1092_p12) }
  0x62   : > { %548 = vperm.xlu0 (!%p1092_p12), %1270, %v545_v61   ;;  %1163 = vmatprep.subr.bf16.mxu0 (!%p1092_p12), %v1413_v63 }
  0x63   : > { %1154 = vmatpush3.bf16.msra.mxu1 %v1269_v17 }
  0x64   : > { %1171 = vmatprep.subr.bf16.mxu1 (!%p1092_p12), %v1413_v63 }
  0x65   : > { %1164 = vmatpush3.bf16.msra.mxu0 (!%p1092_p12), %v1273_v2 }
  0x66   : > { %1165 = vmatprep.subr.bf16.mxu0 (!%p1092_p12), %v1413_v63 }
  0x69   : > { %1166 = vmatpush3.bf16.msra.mxu0 (!%p1092_p12), %v1274_v3 }
  0x6a   : > { %1185 = vmatprep.subr.bf16.mxu0 (!%p1092_p12), %v1413_v63 }
  0xd8   : > { %v509_v32 = vpop.permute.xlu0 %508 }
  0xdc   : > { %v514_v42 = vpop.permute.xlu0 %513 }
  0xe1   : > { %v549_v5 = vpop.permute.xlu0 (!%p1092_p12), %548 }
 0x12f   : > { %v409_v22 = vpop.f32.mrb[0].mxu0 }
 0x130   : > { %v410_v23 = vadd.f32 %v1084_v21, %v409_v22  ;;  %v1145_v24 = vpop.f32.mrb[1].mxu0 }
 0x131   : > { %v412_v25 = vpop.f32.mrb[2].mxu0 }
 0x132   : > { %v413_v26 = vadd.f32 %v1084_v21, %v412_v25  ;;  %v1146_v27 = vpop.f32.mrb[3].mxu0  ;;  %v416_v28 = vmax.f32 %v410_v23, 0.0  ;;  %v1276_v21 = vld [vmem:[#allocation5 + $0x50] sm:$0xff] (!%p1092_p12)  }
 0x133   : > { %v1415_v27 = vmov (!%p1092_p12), 65535  }
 0x134   : > { %v417_v29 = vmax.f32 %v413_v26, 0.0  ;;  %v1099_v26 = vld [vmem:[%s1674_s4 + $0x18] ss:$0 sm:$0xff] (!%p1092_p12) }
 0x136   : > { %v418_v30 = vpack.c.bf16 %v417_v29, %v416_v28  ;;  %v741_v28 = vsel (!%p1092_p12), %vm739_vm10, 4294967295, %v1415_v27 }
 0x138   : > { %1156 = vmatmul.mubr.msk.bf16.vlgmr.msra.gmra.mrb[0].mxu1 %vm456_vm5, %v418_v30  ;;  %v1100_v30 = vld [vmem:[%s1674_s4 + $0x20] ss:$0 sm:$0xff] (!%p1092_p12) }
 0x139   : > { %1175 = vmatprep.mubr.msk.bf16.mxu1 (!%p1092_p12), %vm1414_vm8, %v1413_v63  ;;  %1172 = vmatpush3.bf16.msra.mxu1 (!%p1092_p12), %v1275_v20 }
 0x13a   : > { %1173 = vmatprep.subr.bf16.mxu1 (!%p1092_p12), %v1413_v63 }
 0x13d   : > { %1174 = vmatpush3.bf16.msra.mxu1 (!%p1092_p12), %v1276_v21 }
 0x13e   : > { %1179 = vmatprep.subr.bf16.mxu1 (!%p1092_p12), %v1413_v63 }
 0x20b   : > { %v494_v33 = vpop.f32.mrb[0].mxu1 }
 0x20c   : > { %v495_v34 = vadd.f32 %v1086_v31, %v494_v33  ;;  %v1157_v35 = vpop.f32.mrb[1].mxu1  ;;  %v742_v33 = vsel (!%p1092_p12), %vm740_vm11, %v741_v28, 0 }
 0x20d   : > { %v497_v36 = vpop.f32.mrb[2].mxu1 }
 0x20e   : > { %v501_v37 = vmax.f32 %v495_v34, 0.0  ;;  %v498_v38 = vadd.f32 %v1086_v31, %v497_v36  ;;  %v1158_v39 = vpop.f32.mrb[3].mxu1  ;;  %v1277_v31 = vld [vmem:[#allocation5 + $0x58] sm:$0x1f] (!%p1092_p12)  }
 0x20f   : > { %v744_v35 = vand.u32 (!%p1092_p12), %v1277_v31, %v742_v33  ;;  %v1279_v39 = vld [vmem:[#allocation5 + $0x68] sm:$0xff] (!%p1092_p12)  }
 0x210   : > { %v516_v40 = vmul.f32 %v509_v32, %v501_v37  ;;  %v502_v41 = vmax.f32 %v498_v38, 0.0  ;;  %v722_v37 = vld [vmem:[#allocation5 + $0x80] sm:$0x1] (!%p1092_p12) }
 0x211   : > { %v1278_v38 = vld [vmem:[#allocation5 + $0x60] sm:$0xff] (!%p1092_p12)  }
 0x212   : > { %v518_v43 = vsel %vm456_vm5, %v516_v40, 0.0  ;;  %v517_v44 = vmul.f32 %v514_v42, %v502_v41  ;;  %v1280_v40 = vld [vmem:[#allocation5 + $0x70] sm:$0xff] (!%p1092_p12)   ;;  %v1281_v41 = vld [vmem:[#allocation5 + $0x78] sm:$0xff] (!%p1092_p12)   ;;  %v786_v42 = vlaneseq (!%p1092_p12) }
 0x213   : > { %v519_v45 = vrot.slane %v518_v43, 4 }
 0x214   : > { %v525_v46 = vsel %vm456_vm5, %v517_v44, 0.0  ;;  %v787_v44 = vshrl.u32 (!%p1092_p12), %v786_v42, 7 }
 0x215   : > { %v520_v47 = vadd.f32 %v519_v45, %v518_v43  ;;  %v526_v48 = vrot.slane %v525_v46, 4 }
 0x217   : > { %v521_v49 = vrot.slane %v520_v47, 2  ;;  %v527_v50 = vadd.f32 %v526_v48, %v525_v46  ;;  %v788_v48 = vsub.s32 (!%p1092_p12), 0, %v787_v44 }
 0x219   : > { %v522_v51 = vadd.f32 %v521_v49, %v520_v47  ;;  %v528_v52 = vrot.slane %v527_v50, 2  ;;  %v794_v49 = vsub.s32 (!%p1092_p12), 1, %v787_v44 }
 0x21b   : > { %v523_v53 = vrot.slane %v522_v51, 1  ;;  %v529_v54 = vadd.f32 %v528_v52, %v527_v50  ;;  %v1104_v50 = vld [vmem:[%s1674_s4 + $0x28] ss:$0 sm:$0xff] (!%p1092_p12) }
 0x21d   : > { %v530_v55 = vrot.slane %v529_v54, 1  ;;  %v524_v56 = vadd.f32 %v523_v53, %v522_v51 }
 0x21e   : > { %543 = sbr.rel (%p1092_p12) target bundleno = 2708 (0xa94), region = 128 }
 0x21f   : > { %v531_v58 = vadd.f32 %v530_v55, %v529_v54 }
 0x221   : > { %v535_v59 = vsel %vm534_vm6, %v531_v58, %v524_v56 }
 0x222   : > { %v537_v60 = vadd.f32 %v535_v59, %v503_v57 }
 0x224   : > { %539 = vst.msk [vmem:[#allocation2] sm:$0x3] %vm538_vm7, %v537_v60 }
 0x22b   : > { %v544_v4 = vld [vmem:[#allocation2] sm:$0x3] }
 0x22c   : > { %v551_v6 = vmul.f32 %v549_v5, %v544_v4 }
 0x22e   : > { %v552_v7 = vpack.c.bf16 %v551_v6, %v551_v6 }
 0x230   : > { %1168 = vmatmul.mubr.msk.bf16.vlgmr.msra.gmra.mrb[0].mxu0 %vm456_vm5, %v552_v7 }
 0x231   : > { %1193 = vmatprep.mubr.msk.bf16.mxu0 %vm1414_vm8, %v1413_v63  ;;  %1186 = vmatpush3.bf16.msra.mxu0 %v1278_v38 }
 0x232   : > { %1187 = vmatprep.subr.bf16.mxu0 %v1413_v63 }
 0x235   : > { %1188 = vmatpush3.bf16.msra.mxu0 %v1279_v39 }
 0x236   : > { %1189 = vmatprep.subr.bf16.mxu0 %v1413_v63 }
 0x239   : > { %1190 = vmatpush3.bf16.msra.mxu0 %v1280_v40 }
 0x23a   : > { %1191 = vmatprep.subr.bf16.mxu0 %v1413_v63 }
 0x23d   : > { %1192 = vmatpush3.bf16.msra.mxu0 %v1281_v41 }
 0x303   : > { %v627_v9 = vpop.f32.mrb[0].mxu0 }
 0x304   : > { %v628_v10 = vadd.f32 %v1093_v8, %v627_v9  ;;  %v1169_v11 = vpop.f32.mrb[1].mxu0 }
 0x305   : > { %v630_v12 = vpop.f32.mrb[2].mxu0 }
 0x306   : > { %v1170_v13 = vpop.f32.mrb[3].mxu0  ;;  %v635_v14 = vsel %vm633_vm9, %v628_v10, 0.0  ;;  %634 = vst.msk [vmem:[#allocation8] sm:$0x3] %vm633_vm9, %v628_v10 }
 0x307   : > { %636 = vadd.xlane.f32.xlu0 %v635_v14 }
 0x394   : > { %v637_v15 = vpop.xlane.xlu0 %636 }
 0x395   : > { %v639_v16 = vmul.f32 0.03125, %v637_v15 }
 0x397   : > { %v640_v17 = vsub.f32 %v628_v10, %v639_v16 }
 0x399   : > { %v641_v18 = vmul.f32 %v640_v17, %v640_v17 }
 0x39b   : > { %v642_v19 = vsel %vm633_vm9, %v641_v18, 0.0 }
 0x39c   : > { %643 = vadd.xlane.f32.xlu1 %v642_v19 }
 0x429   : > { %v644_v22 = vpop.xlane.xlu1 %643 }
 0x42a   : > { %v645_v23 = vmul.f32 0.03125, %v644_v22 }
 0x42c   : > { %v646_v24 = vadd.f32 1e-05, %v645_v23 }
 0x42e   : > { %1282 = vrsqrt.f32 %v646_v24 }
 0x438   : > { %v1283_v25 = vpop.eup %1282 }
 0x439   : > { %v648_v29 = vmul.f32 %v1283_v25, %v640_v17 }
 0x43b   : > { %v654_v32 = vmul.f32 %v1099_v26, %v648_v29 }
 0x43d   : > { %v660_v34 = vadd.f32 %v1100_v30, %v654_v32 }
 0x43f   : > { %v661_v36 = vpack.c.bf16 %v660_v34, %v660_v34 }
 0x441   : > { %1176 = vmatmul.mubr.msk.bf16.vlgmr.msra.gmra.mrb[0].mxu1 %vm678_vm12, %v661_v36 }
 0x442   : > { %1180 = vmatpush3.bf16.msra.mxu1 %v744_v35  ;;  %1181 = vmatprep.mubr.msk.bf16.mxu1 %vm1414_vm8, %v1413_v63 }
 0x449   : > { %1182 = vmatmul.mubr.msk.bf16.vlgmr.msra.gmra.mrb[4].mxu1 %vm735_vm13, %v722_v37 }
 0x514   : > { %v716_v43 = vpop.f32.mrb[0].mxu1 }
 0x515   : > { %v1177_v45 = vpop.f32.mrb[1].mxu1  ;;  %v789_v52 = vrot.slane %v716_v43, %v788_v48  ;;  %v795_v53 = vrot.slane %v716_v43, %v794_v49 }
 0x516   : > { %v719_v46 = vpop.f32.mrb[2].mxu1 }
 0x517   : > { %v1178_v47 = vpop.f32.mrb[3].mxu1 }
 0x51c   : > { %v780_v51 = vpop.f32.mrb[4].mxu1 }
 0x51d   : > { %v781_v54 = vadd.f32 %v1104_v50, %v780_v51  ;;  %v1183_v55 = vpop.f32.mrb[5].mxu1 }
 0x51e   : > { %v783_v56 = vpop.f32.mrb[6].mxu1 }
 0x51f   : > { %v790_v57 = vadd.f32 %v789_v52, %v781_v54  ;;  %v796_v58 = vadd.f32 %v795_v53, %v781_v54  ;;  %v1184_v59 = vpop.f32.mrb[7].mxu1 }
 0x521   : > { %v797_v60 = vmax.f32 %v796_v58, 0.0  ;;  %v791_v61 = vmax.f32 %v790_v57, 0.0 }
 0x523   : > { %v799_v62 = vrot.slane %v797_v60, 6 }
 0x525   : > { %v801_v63 = vsel %vm369_vm2, %v791_v61, %v799_v62  ;;  %vm965_vm2 = vcmask 68608  }
 0x526   : > { %v802_v0 = vpack.c.bf16 %v801_v63, %v801_v63 }
 0x528   : > { %1194 = vmatmul.mubr.msk.bf16.vlgmr.msra.gmra.mrb[4].mxu0 %vm456_vm5, %v802_v0 }
 0x5fb   : > { %v877_v2 = vpop.f32.mrb[4].mxu0 }
 0x5fc   : > { %v878_v3 = vadd.f32 %v1107_v1, %v877_v2  ;;  %v1195_v4 = vpop.f32.mrb[5].mxu0 }
 0x5fd   : > { %v880_v5 = vpop.f32.mrb[6].mxu0 }
 0x5fe   : > { %v1196_v6 = vpop.f32.mrb[7].mxu0  ;;  %v883_v7 = vmul.f32 %v878_v3, %v878_v3 }
 0x600   : > { %v885_v8 = vsel %vm884_vm14, %v883_v7, 0.0 }
 0x601   : > { %886 = vadd.xlane.f32.xlu1 %v885_v8 }
 0x612   : > { %892 = vrot.lane.b32.xlu1 %v878_v3, %s1416_s29 }
 0x68e   : > { %v887_v9 = vpop.xlane.xlu1 %886 }
 0x68f   : > { %v888_v10 = vadd.f32 1e-08, %v887_v9 }
 0x691   : > { %1284 = vrsqrt.f32 %v888_v10 }
 0x692   : > { %v893_v13 = vpop.permute.xlu1 %892 }
 0x69b   : > { %v1285_v11 = vpop.eup %1284 }
 0x69c   : > { %v890_v12 = vmul.f32 %v1285_v11, %v878_v3 }
 0x69e   : > { %v895_v14 = vmul.f32 %v893_v13, %v890_v12 }
 0x6a0   : > { %v896_v15 = vsel %vm884_vm14, %v895_v14, 0.0 }
 0x6a1   : > { %897 = vadd.xlane.f32.xlu1 %v896_v15 }
 0x72e   : > { %v898_v16 = vpop.xlane.xlu1 %897 }
 0x72f   : > { %v899_v17 = vmul.f32 %v898_v16, %v890_v12 }
 0x731   : > { %901 = vrot.lane.b32.xlu0 %v899_v17, %s1417_s20 }
 0x7a3   : > { %v902_v18 = vpop.permute.xlu0 %901 }
 0x7a4   : > { %v904_v19 = vsub.f32 %v878_v3, %v902_v18 }
 0x7a6   : > { %v905_v20 = vmul.f32 %v904_v19, %v904_v19 }
 0x7a8   : > { %907 = vrot.lane.b32.xlu0 %v905_v20, %s1416_s29 }
 0x81a   : > { %v908_v21 = vpop.permute.xlu0 %907 }
 0x81b   : > { %v910_v22 = vsel %vm884_vm14, %v908_v21, 0.0 }
 0x81c   : > { %911 = vadd.xlane.f32.xlu0 %v910_v22 }
 0x8a9   : > { %v912_v23 = vpop.xlane.xlu0 %911 }
 0x8aa   : > { %v913_v24 = vadd.f32 1e-08, %v912_v23 }
 0x8ac   : > { %1286 = vrsqrt.f32 %v913_v24 }
 0x8b6   : > { %v1287_v25 = vpop.eup %1286 }
 0x8b7   : > { %v915_v26 = vmul.f32 %v1287_v25, %v904_v19 }
 0x8b9   : > { %921 = vrot.lane.b32.xlu1 %v915_v26, %s1418_s23  ;;  %v962_v45 = vsel %vm364_vm4, %v890_v12, %v915_v26 }
 0x8bd   : > { %934 = vrot.lane.b32.xlu1 %v915_v26, %s1419_s26 }
 0x8c1   : > { %917 = vrot.lane.b32.xlu1 %v915_v26, %s1420_s21 }
 0x8c5   : > { %930 = vrot.lane.b32.xlu1 %v915_v26, %s1421_s30 }
 0x92b   : > { %v922_v27 = vpop.permute.xlu1 %921 }
 0x92c   : > { %v924_v28 = vmul.f32 %v922_v27, %v890_v12 }
 0x92e   : > { %926 = vrot.lane.b32.xlu1 %v924_v28, %s1421_s30 }
 0x92f   : > { %v935_v29 = vpop.permute.xlu1 %934 }
 0x930   : > { %v937_v30 = vmul.f32 %v935_v29, %v890_v12 }
 0x932   : > { %939 = vrot.lane.b32.xlu0 %v937_v30, %s1422_s27 }
 0x933   : > { %v918_v31 = vpop.permute.xlu1 %917 }
 0x934   : > { %v920_v33 = vmul.f32 %v918_v31, %v890_v12 }
 0x937   : > { %v931_v32 = vpop.permute.xlu1 %930 }
 0x938   : > { %v933_v36 = vmul.f32 %v931_v32, %v890_v12 }
 0x9a0   : > { %v927_v34 = vpop.permute.xlu1 %926 }
 0x9a1   : > { %v929_v35 = vsub.f32 %v920_v33, %v927_v34 }
 0x9a3   : > { %944 = vrot.lane.b32.xlu1 %v929_v35, %s1421_s30 }
 0x9a4   : > { %v940_v37 = vpop.permute.xlu0 %939 }
 0x9a5   : > { %v942_v38 = vsub.f32 %v933_v36, %v940_v37 }
 0x9a7   : > { %948 = vrot.lane.b32.xlu1 %v942_v38, %s1421_s30 }
 0x9ab   : > { %951 = vrot.lane.b32.xlu1 %v929_v35, %s1422_s27 }
 0xa15   : > { %v945_v39 = vpop.permute.xlu1 %944 }
 0xa19   : > { %v949_v40 = vpop.permute.xlu1 %948 }
 0xa1a   : > { %v955_v41 = vsel %vm954_vm15, %v945_v39, %v949_v40 }
 0xa1d   : > { %v952_v42 = vpop.permute.xlu1 %951 }
 0xa1e   : > { %v957_v43 = vsel %vm956_vm0, %v955_v41, %v952_v42 }
 0xa1f   : > { %959 = vrot.lane.b32.xlu1 %v957_v43, %s1423_s7 }
 0xa91   : > { %v960_v44 = vpop.permute.xlu1 %959 }
 0xa92   : > { %v964_v46 = vsel %vm963_vm1, %v962_v45, %v960_v44 }
 0xa93   : > { %966 = vst.msk [vmem:[#allocation9] sm:$0xf] %vm965_vm2, %v964_v46 }
 0xa94 PF: > { %p1215_p0 = scmp.eq.s32.totalorder %s1477_s24, 1  ;;  %s1424_s10 = smov [#allocation8]  }
 0xa95   : > { %s974_s11 = sshll.u32 %s1424_s10, 4  ;;  %s1425_s12 = smov [#allocation9]   ;;  %s975_s11 = int_to_ptr.vmem [resolvable:$true] %s974_s11 }
 0xa96   : > { %s985_s13 = sshll.u32 %s1425_s12, 4  ;;  %s1316_s9 = scalar_lea.vmem %s975_s11, 32  ;;  %s986_s13 = int_to_ptr.vmem [resolvable:$true] %s985_s13 }
 0xa97   : > { %p1317_p1 = scmp.ne.s32.totalorder %s975_s11, %s1316_s9  ;;  %p1323_p5 = scmp.lt.s32.totalorder %s975_s11, %s975_s11 }
 0xa98   : > { %p1324_p9 = scmp.lt.s32.totalorder %s1316_s9, %s1316_s9 }
 0xa99   : > { %p1318_p2 = pnand %p1317_p1, %p1215_p0 }
 0xa9a   : > { %p1325_p11 = por %p1324_p9, %p1323_p5 }
 0xa9b   : > { %p1319_p3 = pneg %p1318_p2 }
 0xa9d   : > { %p1326_p13 = pnand %p1325_p11, %p1319_p3 }
 0xa9f   : > { %1329 = shalt.err (!%p1326_p13)
}
 0xaa0   : > { %s1330_s15 = scalar_lea.hbm %s1675_s5, 32 }
 0xaa1   : > { %p1331_p4 = scmp.ne.s32.totalorder %s1675_s5, %s1330_s15  ;;  %p1336_p8 = scmp.lt.u32.totalorder %s1330_s15, %s1675_s5 }
 0xaa3   : > { %p1332_p6 = pnand %p1331_p4, %p1215_p0 }
 0xaa5   : > { %p1333_p7 = pneg %p1332_p6 }
 0xaa7   : > { %p1338_p10 = pnand %p1336_p8, %p1333_p7 }
 0xaa9   : > { %1341 = shalt.err (!%p1338_p10)
}
 0xaaa   : > { %1202 = dma.vmem_to_hbm [thread:$0]  (%p1215_p0), %s975_s11, 32, %s1675_s5, [#allocation7]  }
 0xaab   : > { %s1342_s23 = scalar_lea.vmem %s986_s13, 64  ;;  %p1349_p3 = scmp.lt.s32.totalorder %s986_s13, %s986_s13 }
 0xaac   : > { %p1343_p12 = scmp.ne.s32.totalorder %s986_s13, %s1342_s23  ;;  %p1350_p5 = scmp.lt.s32.totalorder %s1342_s23, %s1342_s23 }
 0xaae   : > { %p1344_p1 = pnand %p1343_p12, %p1215_p0  ;;  %p1351_p9 = por %p1350_p5, %p1349_p3 }
 0xab0   : > { %p1345_p2 = pneg %p1344_p1 }
 0xab2   : > { %p1352_p11 = pnand %p1351_p9, %p1345_p2 }
 0xab4   : > { %1355 = shalt.err (!%p1352_p11)
}
 0xab5   : > { %s1356_s30 = scalar_lea.hbm %s1676_s6, 64 }
 0xab6   : > { %p1357_p13 = scmp.ne.s32.totalorder %s1676_s6, %s1356_s30  ;;  %p1362_p7 = scmp.lt.u32.totalorder %s1356_s30, %s1676_s6 }
 0xab8   : > { %p1358_p4 = pnand %p1357_p13, %p1215_p0 }
 0xaba   : > { %p1359_p6 = pneg %p1358_p4 }
 0xabc   : > { %p1364_p8 = pnand %p1362_p7, %p1359_p6 }
 0xabe   : > { %1367 = shalt.err (!%p1364_p8)
}
 0xabf   : > { %1204 = dma.vmem_to_hbm [thread:$0]  (%p1215_p0), %s986_s13, 64, %s1676_s6, [#allocation10]  }
 0xac0   : > { %1385 = dma.done.wait (%p1215_p0), [#allocation7], 32  }
 0xac1   : > { %1387 = vsyncadd (%p1215_p0), [#allocation7], 4294967264 }
 0xac2   : > { %1389 = dma.done.wait (%p1215_p0), [#allocation10], 64  }
 0xac3   : > { %1391 = vsyncadd (%p1215_p0), [#allocation10], 4294967232 }
 0xac4 PF: > { %p17_p10 = scmp.ge.s32.totalorder %s1480_s25, 4   ;;  %s1688_s21 = smov %s1398_s22 }
 0xac5   : > { %s1689_s22 = smov %s1490_s28  ;;  %s1690_s23 = smov %s1480_s25 }
 0xac6   :  { %19 = sbr.rel (!%p17_p10) target bundleno = 4 (0x4), region = 177 }
 0xacd   :  { %1002 = vsyncpa [#allocation6], 1 }
 0xace   :  { %1004 = vsyncpa [#allocation6 + $0x1], 1 }
 0xacf   :  { %1005 = vsyncpa [#allocation7], 1 }
 0xad0   :  { %1007 = vsyncpa [#allocation7 + $0x1], 1 }
 0xad1   :  { %1008 = vsyncpa [#allocation10], 1 }

</bundles_post_ra>
